<compile_context>
chip_gen: v6e
topology: v6e:2x2x1
jax: 0.10.0
libtpu: 0.0.40
codegen_flags: <defaults>
</compile_context>

<pallas_src>
import functools
from functools import partial

import jax
import jax.numpy as jnp
from jax.experimental import pallas as pl
from jax.experimental.pallas import tpu as pltpu

_LANE = 128  # minimum lane granularity for the zero-copy 2D slab


@functools.lru_cache(maxsize=1)
def _tpu_tuning():
    """Return (num_tensorcores_per_chip, target_block_bytes, vmem_limit_bytes, pallas_cutoff_bytes).

    Defensive hardware probing: any failure falls back to conservative values that are
    correct (and good) on every TPU generation.
    """
    n_cores = 1
    is_v7 = False
    try:
        info = pltpu.get_tpu_info()
        for attr in ("num_cores", "core_count", "num_tensorcores", "tensorcore_count"):
            v = getattr(info, attr, None)
            if v:
                n_cores = max(n_cores, int(v))
                break
        ver = getattr(info, "chip_version", None)
        if ver is not None and "7" in str(ver):
            is_v7 = True
    except Exception:
        pass
    try:
        kind = str(getattr(jax.devices()[0], "device_kind", "")).lower()
        if "v7" in kind:
            is_v7 = True
        # v4 / v5p are 2-TC megacore chips as well.
        if ("v4" in kind) or ("v5p" in kind) or ("v5 p" in kind):
            n_cores = max(n_cores, 2)
    except Exception:
        pass
    if is_v7:
        n_cores = max(n_cores, 2)

    if is_v7:
        # 2 in + 2 out buffers at 8 MiB = 32 MiB << 64 MiB physical VMEM on v7x.
        block_bytes = 8 << 20
        vmem_limit = 40 << 20
        cutoff_bytes = 4 << 20
    else:
        block_bytes = 4 << 20
        vmem_limit = 32 << 20
        cutoff_bytes = (4 << 20) if n_cores >= 2 else (1 << 20)
    return n_cores, block_bytes, vmem_limit, cutoff_bytes


def _act_quant_kernel(x_ref, o_ref, *, scale):
    # Compute in f32 (bf16 inputs are promoted, quantized, cast back).
    x = x_ref[...].astype(jnp.float32)
    y = jnp.clip(x * 0.1, 0.0, 1.0)
    # round-half-to-even matches torch.round; exact division keeps bit parity with the
    # reference (HBM-bound kernel -> the division is free in wall time).
    o_ref[...] = (jnp.round(y * scale) / scale).astype(o_ref.dtype)


def _quantize_jnp(x, scale):
    y = jnp.clip(x.astype(jnp.float32) * 0.1, 0.0, 1.0)
    return (jnp.round(y * scale) / scale).astype(x.dtype)


def activation_quantize(x, a_bits, *, use_pallas=None, donate_input=False):
    """JAX/Pallas equivalent of the PyTorch activation_quantize.forward."""
    if a_bits == 32:
        return x
    assert a_bits != 1, "Binary quantization is not supported"
    # TODO(synk): Round.backward straight-through gradient is not implemented here
    # (forward-only); wrap with jax.custom_vjp if training gradients are needed.

    scale = float(2 ** a_bits - 1)

    total = x.size
    itemsize = jnp.dtype(x.dtype).itemsize
    n_cores, block_bytes, vmem_limit, cutoff_bytes = _tpu_tuning()

    if use_pallas is None:
        # Below ~1-4 MiB the whole op is <~1 us of HBM traffic; launch + reshape plumbing
        # and lost XLA fusion dominate, so let XLA fuse the 4 elementwise ops instead.
        use_pallas = total * itemsize >= cutoff_bytes
    if (not use_pallas) or total < _LANE:
        return _quantize_jnp(x, scale)

    orig_shape = x.shape
    orig_dtype = x.dtype

    # Largest 128-aligned prefix goes through the kernel via a zero-copy reshape; any
    # tiny remainder (< 128 elements) is handled with plain jnp.  No jnp.pad anywhere.
    main = (total // _LANE) * _LANE
    tail = total - main

    x_flat = jnp.ravel(x)
    x_main = x_flat[:main] if tail else x_flat

    # Widest lane dimension that evenly tiles the prefix (lane-dense rows -> unmasked
    # vst, fatter contiguous DMA rows).  Rows need NOT be a multiple of 8: the partial
    # last row-block is masked by Pallas.
    lanes = _LANE
    for cand in (1024, 512, 256):
        if main % cand == 0:
            lanes = cand
            break
    rows = main // lanes
    x2d = x_main.reshape(rows, lanes)

    # Block sizing: big enough to amortize the ~0.35 us/step grid overhead, small enough
    # that 2-in + 2-out double buffers fit the scoped VMEM limit on every generation.
    rows_per_block = max(8, (block_bytes // (lanes * itemsize)) // 8 * 8)
    if rows > 8:
        # Guarantee >= 2*num_TCs grid steps: shards across both TensorCores on v7x and
        # gives the software pipeline something to overlap even on single-core chips.
        desired_steps = max(2, 2 * n_cores)
        cap = max(8, ((pl.cdiv(rows, desired_steps) + 7) // 8) * 8)
        rows_per_block = min(rows_per_block, cap)
    tile_r = min(rows, rows_per_block)  # either == rows (full dim) or a multiple of 8
    grid = (pl.cdiv(rows, tile_r),)     # partial last block masked by Pallas

    cost = pl.CostEstimate(
        flops=5 * main,
        transcendentals=0,
        bytes_accessed=2 * main * itemsize,
    )

    kernel = partial(_act_quant_kernel, scale=scale)

    # TODO(synk): if an xprof trace on v7x shows exposed input DMA at the shorter step
    # time, sweep pipeline_mode=pl.Buffered(3) on the input BlockSpec.
    out2d = pl.pallas_call(
        kernel,
        out_shape=jax.ShapeDtypeStruct((rows, lanes), orig_dtype),
        grid_spec=pltpu.PrefetchScalarGridSpec(
            num_scalar_prefetch=0,
            grid=grid,
            in_specs=[pl.BlockSpec((tile_r, lanes), lambda i: (i, 0))],
            out_specs=pl.BlockSpec((tile_r, lanes), lambda i: (i, 0)),
        ),
        compiler_params=pltpu.CompilerParams(
            dimension_semantics=("parallel",),
            vmem_limit_bytes=vmem_limit,
            # Let XLA fuse the ravel/slice/reshape producer chain into the pallas operand
            # so the unaligned-prefix slice never materializes a full-size HBM copy.
            allow_input_fusion=[True],
        ),
        cost_estimate=cost,
        # Only reuses the operand buffer for the output (shapes/dtypes match); does not
        # change HBM traffic but avoids a second full-size allocation when legal.
        input_output_aliases=({0: 0} if donate_input else {}),
    )(x2d)

    out_main = out2d.reshape(-1)
    if tail:
        out_tail = _quantize_jnp(x_flat[main:], scale)
        out_flat = jnp.concatenate([out_main, out_tail])
    else:
        out_flat = out_main
    return out_flat.reshape(orig_shape)


def _reference(x, a_bits):
    if a_bits == 32:
        return x
    scale = float(2 ** a_bits - 1)
    y = jnp.clip(x * 0.1, 0.0, 1.0)
    return jnp.round(y * scale) / scale


if __name__ == "__main__":
    a_bits = 4

    # NCHW activation tensor, small shape consistent with the module's usage.
    x = jax.random.normal(jax.random.PRNGKey(0), (2, 4, 16, 16), dtype=jnp.float32) * 10.0
    out = jax.block_until_ready(activation_quantize(x, a_bits, use_pallas=True))
    ref = _reference(x, a_bits)
    assert out.shape == x.shape and out.dtype == x.dtype
    assert jnp.allclose(out, ref, atol=1e-6), "mismatch vs reference"

    # Moderately sized aligned tensor: exercises the multi-step (>=2) grid path.
    x_big = jax.random.normal(jax.random.PRNGKey(2), (4, 32, 32, 32), dtype=jnp.float32) * 10.0
    out_big = jax.block_until_ready(activation_quantize(x_big, a_bits, use_pallas=True))
    assert jnp.allclose(out_big, _reference(x_big, a_bits), atol=1e-6), "mismatch (multi-step grid)"

    # Non-128-aligned size: exercises the aligned-prefix kernel + tiny jnp tail path.
    x2 = jax.random.normal(jax.random.PRNGKey(1), (3, 5, 7, 11), dtype=jnp.float32) * 10.0
    out2 = jax.block_until_ready(activation_quantize(x2, a_bits, use_pallas=True))
    assert jnp.allclose(out2, _reference(x2, a_bits), atol=1e-6), "mismatch (tail path)"

    # a_bits == 32 passthrough path.
    out32 = jax.block_until_ready(activation_quantize(x, 32))
    assert jnp.array_equal(out32, x)

    print("KERNEL_OK")
</pallas_src>

<mosaic_0001>
module attributes {stable_mosaic.version = 11 : i64} {
  func.func @_act_quant_kernel(%arg0: i32, %arg1: memref<2x1024xf32, #tpu.memory_space<vmem>>, %arg2: memref<2x1024xf32, #tpu.memory_space<vmem>>) attributes {dimension_semantics = [#tpu.dimension_semantics<parallel>], iteration_bounds = array<i64: 1>, scalar_prefetch = 0 : i64, scratch_operands = 0 : i64, tpu.core_type = #tpu.core_type<tc>, window_params = [{transform_indices = @transform_0, window_bounds = array<i64: 2, 1024>}, {transform_indices = @transform_1, window_bounds = array<i64: 2, 1024>}]} {
    %c0 = arith.constant 0 : index
    %c0_0 = arith.constant 0 : index
    %0 = vector.load %arg1[%c0, %c0_0] : memref<2x1024xf32, #tpu.memory_space<vmem>>, vector<2x1024xf32>
    %cst = arith.constant 1.000000e-01 : f32
    %1 = vector.broadcast %cst : f32 to vector<2x1024xf32>
    %2 = arith.mulf %0, %1 : vector<2x1024xf32>
    %cst_1 = arith.constant 0.000000e+00 : f32
    %cst_2 = arith.constant 1.000000e+00 : f32
    %3 = vector.broadcast %cst_1 : f32 to vector<2x1024xf32>
    %4 = arith.maximumf %3, %2 : vector<2x1024xf32>
    %5 = vector.broadcast %cst_2 : f32 to vector<2x1024xf32>
    %6 = arith.minimumf %5, %4 : vector<2x1024xf32>
    %cst_3 = arith.constant 1.500000e+01 : f32
    %7 = vector.broadcast %cst_3 : f32 to vector<2x1024xf32>
    %8 = arith.mulf %6, %7 : vector<2x1024xf32>
    %9 = math.roundeven %8 : vector<2x1024xf32>
    %cst_4 = arith.constant 1.500000e+01 : f32
    %10 = vector.broadcast %cst_4 : f32 to vector<2x1024xf32>
    %11 = arith.divf %9, %10 : vector<2x1024xf32>
    %c0_5 = arith.constant 0 : index
    %c0_6 = arith.constant 0 : index
    %12 = vector.load %arg2[%c0_5, %c0_6] : memref<2x1024xf32, #tpu.memory_space<vmem>>, vector<2x1024xf32>
    tpu.vector_store %arg2[%c0_5, %c0_6], %11 {strides = array<i32>} : memref<2x1024xf32, #tpu.memory_space<vmem>>, vector<2x1024xf32>,
    return
  }
  func.func @transform_0(%arg0: i32) -> (i32, i32) {
    %c0_i32 = arith.constant 0 : i32
    %c0_i32_0 = arith.constant 0 : i32
    return %arg0, %c0_i32 : i32, i32
  }
  func.func @transform_1(%arg0: i32) -> (i32, i32) {
    %c0_i32 = arith.constant 0 : i32
    %c0_i32_0 = arith.constant 0 : i32
    return %arg0, %c0_i32 : i32, i32
  }
}

</mosaic_0001>

<bundles_post_ra>
// kernel: tpu_custom_call.1
= control target key start
LH: loop header
LB: loop body
LE: loop exit
PB: predicated region body
PF: predicated region fallthrough
CT: control target
= control target key end

     0   :  { %6 = vsyncpa [#allocation3], 0  ;;  %s133_s0 = inlined_call_operand.hbm [shape: f32[2,1024], index: 0, kind: input, shape index: {}]   ;;  %s134_s1 = inlined_call_operand.hbm [shape: f32[2,1024], index: 1, kind: output, shape index: {}]  }
   0x1   :  { %7 = vsyncpa [#allocation4], 0  ;;  %s115_s6 = smov [#allocation2]  }
   0x2   :  { %s14_s7 = sshll.u32 %s115_s6, 4  ;;  %s15_s7 = int_to_ptr.vmem [resolvable:$true] %s14_s7 }
   0x3   :  { %s79_s8 = scalar_lea.vmem %s15_s7, 256  ;;  %p84_p1 = scmp.lt.s32.totalorder %s15_s7, %s15_s7 }
   0x4   :  { %p80_p0 = scmp.ne.s32.totalorder %s15_s7, %s79_s8  ;;  %p85_p2 = scmp.lt.s32.totalorder %s79_s8, %s79_s8 }
   0x6   :  { %p86_p3 = por %p85_p2, %p84_p1 }
   0x8   :  { %p87_p4 = pnand %p86_p3, %p80_p0 }
   0xa   :  { %90 = shalt.err (!%p87_p4)
}
   0xb   :  { %17 = dma.hbm_to_vmem [thread:$0]  %s133_s0, 256, %s15_s7, [#allocation3]  }
   0xc   :  { %111 = dma.done.wait [#allocation3], 256  }
   0xd   :  { %112 = vsyncadd [#allocation3], 4294967040  ;;  %v21_v0 = vld [vmem:[#allocation2] sm:$0xff]  ;;  %v22_v1 = vld [vmem:[#allocation2 + $0x8] sm:$0xff]  ;;  %s116_s0 = smov [#allocation5]  }
   0xe   :  { %v23_v2 = vmul.f32 0.1, %v21_v0  ;;  %v24_v3 = vmul.f32 0.1, %v22_v1  ;;  %s44_s11 = sshll.u32 %s116_s0, 4  ;;  %s45_s11 = int_to_ptr.vmem [resolvable:$true] %s44_s11 }
   0xf   :  { %s91_s12 = scalar_lea.vmem %s45_s11, 256  ;;  %p96_p6 = scmp.lt.s32.totalorder %s45_s11, %s45_s11 }
  0x10   :  { %v25_v4 = vmax.f32 %v23_v2, 0.0  ;;  %v26_v5 = vmax.f32 %v24_v3, 0.0  ;;  %p92_p5 = scmp.ne.s32.totalorder %s45_s11, %s91_s12  ;;  %p97_p7 = scmp.lt.s32.totalorder %s91_s12, %s91_s12 }
  0x12   :  { %v27_v6 = vmin.f32 %v25_v4, 1.0  ;;  %v28_v7 = vmin.f32 %v26_v5, 1.0  ;;  %p98_p8 = por %p97_p7, %p96_p6 }
  0x14   :  { %v29_v8 = vmul.f32 15.0, %v27_v6  ;;  %v30_v9 = vmul.f32 15.0, %v28_v7  ;;  %p99_p9 = pnand %p98_p8, %p92_p5 }
  0x16   :  { %v55_v10 = vcvt.f32.s32 %v29_v8  ;;  %v53_v11 = vand.u32 2147483647, %v29_v8  ;;  %v63_v12 = vcvt.f32.s32 %v30_v9  ;;  %v58_v14 = vand.u32 2147483648, %v29_v8 }
  0x17   :  { %v61_v15 = vand.u32 2147483647, %v30_v9  ;;  %v66_v17 = vand.u32 2147483648, %v30_v9 }
  0x18   :  { %v56_v13 = vcvt.s32.f32 %v55_v10  ;;  %v64_v16 = vcvt.s32.f32 %v63_v12  ;;  %vm54_vm0 = vcmp.lt.f32.partialorder %v53_v11, 8388608.0 }
  0x19   :  { %vm62_vm1 = vcmp.lt.f32.partialorder %v61_v15, 8388608.0 }
  0x1a   :  { %v57_v18 = vand.u32 2147483647, %v56_v13  ;;  %v65_v19 = vand.u32 2147483647, %v64_v16 }
  0x1c   :  { %v59_v20 = vor.u32 %v58_v14, %v57_v18  ;;  %v67_v21 = vor.u32 %v66_v17, %v65_v19 }
  0x1e   :  { %v60_v22 = vsel %vm54_vm0, %v59_v20, %v29_v8  ;;  %v68_v24 = vsel %vm62_vm1, %v67_v21, %v30_v9 }
  0x1f   :  { %v34_v23 = vmul.f32 0.06666667, %v60_v22  ;;  %v35_v25 = vmul.f32 0.06666667, %v68_v24 }
  0x21   :  { %36 = vst [vmem:[#allocation5] sm:$0xff] %v34_v23  ;;  %37 = vst [vmem:[#allocation5 + $0x8] sm:$0xff] %v35_v25 }
  0x22   :  { %102 = shalt.err (!%p99_p9)
}
  0x23   :  { %47 = dma.vmem_to_hbm [thread:$0]  %s45_s11, 256, %s134_s1, [#allocation4]  }
  0x24   :  { %113 = dma.done.wait [#allocation4], 256  }
  0x25   :  { %114 = vsyncadd [#allocation4], 4294967040 }
  0x26   :  { %51 = vsyncpa [#allocation3], 1 }
  0x27   :  { %52 = vsyncpa [#allocation4], 1 }

</bundles_post_ra>
